<compile_context>
chip_gen: v7x
topology: tpu7x:2x2x1
jax: 0.10.0
libtpu: 0.0.40
codegen_flags: <defaults>
</compile_context>

<pallas_src>
import functools

import jax
import jax.numpy as jnp
from jax.experimental import pallas as pl
from jax.experimental.pallas import tpu as pltpu

LANE = 128  # hidden dim is zero-padded to a full lane width (exact through ReLU)


def _round_up(v, m):
    return ((v + m - 1) // m) * m


def _pad2(a, rows, cols):
    return jnp.pad(a, ((0, rows - a.shape[0]), (0, cols - a.shape[1])))


# ---------------------------------------------------------------------------
# Kernel: one batch tile through all 7 layers (weights are VMEM-resident).
# ---------------------------------------------------------------------------
def mlp_kernel(x_ref,                    # (tile_b, num_features)
               w_in_ref, b_in_ref,       # (num_features, LANE), (1, LANE)
               w_h_ref, b_h_ref,         # (5, LANE, LANE),      (5, 1, LANE)
               w_out_ref, b_out_ref,     # (LANE, num_labels),   (1, num_labels)
               o_ref):                   # (tile_b, num_labels)
    # input layer (no activation after it, matching the PyTorch forward)
    h = (jnp.dot(x_ref[...], w_in_ref[...], preferred_element_type=jnp.float32)
         + b_in_ref[...])

    # 5 hidden layers: Linear -> ReLU  (static unroll over the stacked weights)
    for l in range(5):
        h = jnp.maximum(
            jnp.dot(h, w_h_ref[l], preferred_element_type=jnp.float32)
            + b_h_ref[l], 0.0)

    # output layer (no activation); stores only the real num_labels columns
    o_ref[...] = (jnp.dot(h, w_out_ref[...], preferred_element_type=jnp.float32)
                  + b_out_ref[...])


# ---------------------------------------------------------------------------
# One-time parameter preparation (padding / casting hoisted out of the forward)
# ---------------------------------------------------------------------------
def prepare_params(params):
    """params: 7 (W_t, b) tuples; W_t shaped (in, out), b shaped (1, out)."""
    (w_in, b_in) = params[0]
    hidden = params[1:6]
    (w_out, b_out) = params[6]

    num_features = w_in.shape[0]
    num_labels = w_out.shape[1]

    w_in_p = _pad2(w_in.astype(jnp.float32), num_features, LANE)   # (F, 128)
    b_in_p = _pad2(b_in.astype(jnp.float32), 1, LANE)               # (1, 128)
    w_h = jnp.stack([_pad2(w.astype(jnp.float32), LANE, LANE) for w, _ in hidden])
    b_h = jnp.stack([_pad2(b.astype(jnp.float32), 1, LANE) for _, b in hidden])
    w_out_p = _pad2(w_out.astype(jnp.float32), LANE, num_labels)    # (128, L)
    b_out_p = b_out.astype(jnp.float32)                             # (1, L)

    return (w_in_p, b_in_p, w_h, b_h, w_out_p, b_out_p)


# ---------------------------------------------------------------------------
# Jitted forward
# ---------------------------------------------------------------------------
@functools.partial(jax.jit, static_argnames=("tile_b",))
def network_forward(x, prepared, tile_b=512):
    w_in_p, b_in_p, w_h, b_h, w_out_p, b_out_p = prepared
    batch, num_features = x.shape
    num_labels = w_out_p.shape[1]

    # --- batch tiling -------------------------------------------------------
    padded_batch = _round_up(batch, 8)
    tile_b = _round_up(max(int(tile_b), 8), 8)          # multiple of 8 (sublane)
    tile_b = min(tile_b, padded_batch)
    # Keep the grid length >= 2 when possible so "parallel" shards across both
    # TensorCores on v7x (no-op elsewhere).
    if padded_batch // tile_b < 2 and padded_batch >= 16:
        tile_b = _round_up(padded_batch // 2, 8)
    padded_batch = pl.cdiv(padded_batch, tile_b) * tile_b

    x_p = jnp.pad(x.astype(jnp.float32), ((0, padded_batch - batch), (0, 0)))

    grid = (padded_batch // tile_b,)

    in_specs = [
        pl.BlockSpec((tile_b, num_features), lambda i: (i, 0)),      # x tile
        pl.BlockSpec((num_features, LANE), lambda i: (0, 0)),        # w_in (resident)
        pl.BlockSpec((1, LANE), lambda i: (0, 0)),                   # b_in
        pl.BlockSpec((5, LANE, LANE), lambda i: (0, 0, 0)),          # stacked hidden W
        pl.BlockSpec((5, 1, LANE), lambda i: (0, 0, 0)),             # stacked hidden b
        pl.BlockSpec((LANE, num_labels), lambda i: (0, 0)),          # w_out
        pl.BlockSpec((1, num_labels), lambda i: (0, 0)),             # b_out
    ]

    out = pl.pallas_call(
        mlp_kernel,
        out_shape=jax.ShapeDtypeStruct((padded_batch, num_labels), jnp.float32),
        grid=grid,
        in_specs=in_specs,
        out_specs=pl.BlockSpec((tile_b, num_labels), lambda i: (i, 0)),
        compiler_params=pltpu.CompilerParams(
            dimension_semantics=("parallel",)),   # megacore sharding on v7x
    )(x_p, w_in_p, b_in_p, w_h, b_h, w_out_p, b_out_p)

    return out[:batch]


# ---------------------------------------------------------------------------
# Init + reference (pure JAX) + demo
# ---------------------------------------------------------------------------
def init_linear(key, in_dim, out_dim):
    """Deterministic init mimicking PyTorch nn.Linear (uniform +/- 1/sqrt(in))."""
    kw, kb = jax.random.split(key)
    bound = 1.0 / jnp.sqrt(jnp.float32(in_dim))
    w_t = jax.random.uniform(kw, (in_dim, out_dim), jnp.float32, -bound, bound)
    b = jax.random.uniform(kb, (1, out_dim), jnp.float32, -bound, bound)
    return w_t, b


def reference_forward(x, params):
    h = x @ params[0][0] + params[0][1]              # input (no activation)
    for w, b in params[1:6]:                          # 5 hidden layers
        h = jnp.maximum(h @ w + b, 0.0)
    return h @ params[6][0] + params[6][1]            # output (no activation)


if __name__ == "__main__":
    num_features, num_labels, num_nodes = 16, 4, 32
    batch = 64   # small demo batch; grid is forced to 2 steps (32 rows each)

    key = jax.random.PRNGKey(0)
    keys = jax.random.split(key, 8)

    params = [
        init_linear(keys[0], num_features, num_nodes),   # input
        init_linear(keys[1], num_nodes, num_nodes),      # first_hidden
        init_linear(keys[2], num_nodes, num_nodes),      # second_hidden
        init_linear(keys[3], num_nodes, num_nodes),      # third_hidden
        init_linear(keys[4], num_nodes, num_nodes),      # fourth_hidden
        init_linear(keys[5], num_nodes, num_nodes),      # fifth_hidden
        init_linear(keys[6], num_nodes, num_labels),     # output
    ]

    x = jax.random.normal(keys[7], (batch, num_features), jnp.float32)

    prepared = prepare_params(params)                 # one-time pad/cast
    out = network_forward(x, prepared)                # jitted: pad + kernel + slice
    out = jax.block_until_ready(out)

    ref = reference_forward(x, params)
    assert out.shape == (batch, num_labels), out.shape
    assert jnp.allclose(out, ref, atol=1e-4, rtol=1e-4), float(
        jnp.max(jnp.abs(out - ref)))

    print("KERNEL_OK")
</pallas_src>

<mosaic_0001>
module attributes {stable_mosaic.version = 11 : i64} {
  func.func @mlp_kernel(%arg0: i32, %arg1: memref<32x16xf32, #tpu.memory_space<vmem>>, %arg2: memref<16x128xf32, #tpu.memory_space<vmem>>, %arg3: memref<1x128xf32, #tpu.memory_space<vmem>>, %arg4: memref<5x128x128xf32, #tpu.memory_space<vmem>>, %arg5: memref<5x1x128xf32, #tpu.memory_space<vmem>>, %arg6: memref<128x4xf32, #tpu.memory_space<vmem>>, %arg7: memref<1x4xf32, #tpu.memory_space<vmem>>, %arg8: memref<32x4xf32, #tpu.memory_space<vmem>>) attributes {dimension_semantics = [#tpu.dimension_semantics<parallel>], iteration_bounds = array<i64: 2>, scalar_prefetch = 0 : i64, scratch_operands = 0 : i64, tpu.core_type = #tpu.core_type<tc>, window_params = [{transform_indices = @transform_0, window_bounds = array<i64: 32, 16>}, {pipeline_mode = #tpu.pipeline_mode<synchronous>, transform_indices = @transform_1, window_bounds = array<i64: 16, 128>}, {pipeline_mode = #tpu.pipeline_mode<synchronous>, transform_indices = @transform_2, window_bounds = array<i64: 1, 128>}, {pipeline_mode = #tpu.pipeline_mode<synchronous>, transform_indices = @transform_3, window_bounds = array<i64: 5, 128, 128>}, {pipeline_mode = #tpu.pipeline_mode<synchronous>, transform_indices = @transform_4, window_bounds = array<i64: 5, 1, 128>}, {pipeline_mode = #tpu.pipeline_mode<synchronous>, transform_indices = @transform_5, window_bounds = array<i64: 128, 4>}, {pipeline_mode = #tpu.pipeline_mode<synchronous>, transform_indices = @transform_6, window_bounds = array<i64: 1, 4>}, {transform_indices = @transform_7, window_bounds = array<i64: 32, 4>}]} {
    %c0 = arith.constant 0 : index
    %c0_0 = arith.constant 0 : index
    %0 = vector.load %arg1[%c0, %c0_0] : memref<32x16xf32, #tpu.memory_space<vmem>>, vector<32x16xf32>
    %c0_1 = arith.constant 0 : index
    %c0_2 = arith.constant 0 : index
    %1 = vector.load %arg2[%c0_1, %c0_2] : memref<16x128xf32, #tpu.memory_space<vmem>>, vector<16x128xf32>
    %cst = arith.constant dense<0.000000e+00> : vector<32x128xf32>
    %2 = tpu.matmul %0, %1, %cst {dimension_numbers = #tpu.dot_dimension_numbers<[1], [0], [0], [1], [0, 0, 1, 1], [], []>} : vector<32x16xf32>, vector<16x128xf32>, vector<32x128xf32> -> vector<32x128xf32>
    %c0_3 = arith.constant 0 : index
    %c0_4 = arith.constant 0 : index
    %3 = vector.load %arg3[%c0_3, %c0_4] : memref<1x128xf32, #tpu.memory_space<vmem>>, vector<1x128xf32>
    %4 = vector.broadcast %3 : vector<1x128xf32> to vector<32x128xf32>
    %5 = arith.addf %2, %4 : vector<32x128xf32>
    %c0_5 = arith.constant 0 : index
    %c0_6 = arith.constant 0 : index
    %c0_7 = arith.constant 0 : index
    %6 = vector.load %arg4[%c0_5, %c0_6, %c0_7] : memref<5x128x128xf32, #tpu.memory_space<vmem>>, vector<1x128x128xf32>
    %7 = vector.shape_cast %6 : vector<1x128x128xf32> to vector<128x128xf32>
    %cst_8 = arith.constant dense<0.000000e+00> : vector<32x128xf32>
    %8 = tpu.matmul %5, %7, %cst_8 {dimension_numbers = #tpu.dot_dimension_numbers<[1], [0], [0], [1], [0, 0, 1, 1], [], []>} : vector<32x128xf32>, vector<128x128xf32>, vector<32x128xf32> -> vector<32x128xf32>
    %c0_9 = arith.constant 0 : index
    %c0_10 = arith.constant 0 : index
    %c0_11 = arith.constant 0 : index
    %9 = vector.load %arg5[%c0_9, %c0_10, %c0_11] : memref<5x1x128xf32, #tpu.memory_space<vmem>>, vector<1x1x128xf32>
    %10 = vector.shape_cast %9 : vector<1x1x128xf32> to vector<1x128xf32>
    %11 = vector.broadcast %10 : vector<1x128xf32> to vector<32x128xf32>
    %12 = arith.addf %8, %11 : vector<32x128xf32>
    %cst_12 = arith.constant 0.000000e+00 : f32
    %13 = vector.broadcast %cst_12 : f32 to vector<32x128xf32>
    %14 = arith.maximumf %12, %13 : vector<32x128xf32>
    %c1 = arith.constant 1 : index
    %c0_13 = arith.constant 0 : index
    %c0_14 = arith.constant 0 : index
    %15 = vector.load %arg4[%c1, %c0_13, %c0_14] : memref<5x128x128xf32, #tpu.memory_space<vmem>>, vector<1x128x128xf32>
    %16 = vector.shape_cast %15 : vector<1x128x128xf32> to vector<128x128xf32>
    %cst_15 = arith.constant dense<0.000000e+00> : vector<32x128xf32>
    %17 = tpu.matmul %14, %16, %cst_15 {dimension_numbers = #tpu.dot_dimension_numbers<[1], [0], [0], [1], [0, 0, 1, 1], [], []>} : vector<32x128xf32>, vector<128x128xf32>, vector<32x128xf32> -> vector<32x128xf32>
    %c1_16 = arith.constant 1 : index
    %c0_17 = arith.constant 0 : index
    %c0_18 = arith.constant 0 : index
    %18 = vector.load %arg5[%c1_16, %c0_17, %c0_18] : memref<5x1x128xf32, #tpu.memory_space<vmem>>, vector<1x1x128xf32>
    %19 = vector.shape_cast %18 : vector<1x1x128xf32> to vector<1x128xf32>
    %20 = vector.broadcast %19 : vector<1x128xf32> to vector<32x128xf32>
    %21 = arith.addf %17, %20 : vector<32x128xf32>
    %cst_19 = arith.constant 0.000000e+00 : f32
    %22 = vector.broadcast %cst_19 : f32 to vector<32x128xf32>
    %23 = arith.maximumf %21, %22 : vector<32x128xf32>
    %c2 = arith.constant 2 : index
    %c0_20 = arith.constant 0 : index
    %c0_21 = arith.constant 0 : index
    %24 = vector.load %arg4[%c2, %c0_20, %c0_21] : memref<5x128x128xf32, #tpu.memory_space<vmem>>, vector<1x128x128xf32>
    %25 = vector.shape_cast %24 : vector<1x128x128xf32> to vector<128x128xf32>
    %cst_22 = arith.constant dense<0.000000e+00> : vector<32x128xf32>
    %26 = tpu.matmul %23, %25, %cst_22 {dimension_numbers = #tpu.dot_dimension_numbers<[1], [0], [0], [1], [0, 0, 1, 1], [], []>} : vector<32x128xf32>, vector<128x128xf32>, vector<32x128xf32> -> vector<32x128xf32>
    %c2_23 = arith.constant 2 : index
    %c0_24 = arith.constant 0 : index
    %c0_25 = arith.constant 0 : index
    %27 = vector.load %arg5[%c2_23, %c0_24, %c0_25] : memref<5x1x128xf32, #tpu.memory_space<vmem>>, vector<1x1x128xf32>
    %28 = vector.shape_cast %27 : vector<1x1x128xf32> to vector<1x128xf32>
    %29 = vector.broadcast %28 : vector<1x128xf32> to vector<32x128xf32>
    %30 = arith.addf %26, %29 : vector<32x128xf32>
    %cst_26 = arith.constant 0.000000e+00 : f32
    %31 = vector.broadcast %cst_26 : f32 to vector<32x128xf32>
    %32 = arith.maximumf %30, %31 : vector<32x128xf32>
    %c3 = arith.constant 3 : index
    %c0_27 = arith.constant 0 : index
    %c0_28 = arith.constant 0 : index
    %33 = vector.load %arg4[%c3, %c0_27, %c0_28] : memref<5x128x128xf32, #tpu.memory_space<vmem>>, vector<1x128x128xf32>
    %34 = vector.shape_cast %33 : vector<1x128x128xf32> to vector<128x128xf32>
    %cst_29 = arith.constant dense<0.000000e+00> : vector<32x128xf32>
    %35 = tpu.matmul %32, %34, %cst_29 {dimension_numbers = #tpu.dot_dimension_numbers<[1], [0], [0], [1], [0, 0, 1, 1], [], []>} : vector<32x128xf32>, vector<128x128xf32>, vector<32x128xf32> -> vector<32x128xf32>
    %c3_30 = arith.constant 3 : index
    %c0_31 = arith.constant 0 : index
    %c0_32 = arith.constant 0 : index
    %36 = vector.load %arg5[%c3_30, %c0_31, %c0_32] : memref<5x1x128xf32, #tpu.memory_space<vmem>>, vector<1x1x128xf32>
    %37 = vector.shape_cast %36 : vector<1x1x128xf32> to vector<1x128xf32>
    %38 = vector.broadcast %37 : vector<1x128xf32> to vector<32x128xf32>
    %39 = arith.addf %35, %38 : vector<32x128xf32>
    %cst_33 = arith.constant 0.000000e+00 : f32
    %40 = vector.broadcast %cst_33 : f32 to vector<32x128xf32>
    %41 = arith.maximumf %39, %40 : vector<32x128xf32>
    %c4 = arith.constant 4 : index
    %c0_34 = arith.constant 0 : index
    %c0_35 = arith.constant 0 : index
    %42 = vector.load %arg4[%c4, %c0_34, %c0_35] : memref<5x128x128xf32, #tpu.memory_space<vmem>>, vector<1x128x128xf32>
    %43 = vector.shape_cast %42 : vector<1x128x128xf32> to vector<128x128xf32>
    %cst_36 = arith.constant dense<0.000000e+00> : vector<32x128xf32>
    %44 = tpu.matmul %41, %43, %cst_36 {dimension_numbers = #tpu.dot_dimension_numbers<[1], [0], [0], [1], [0, 0, 1, 1], [], []>} : vector<32x128xf32>, vector<128x128xf32>, vector<32x128xf32> -> vector<32x128xf32>
    %c4_37 = arith.constant 4 : index
    %c0_38 = arith.constant 0 : index
    %c0_39 = arith.constant 0 : index
    %45 = vector.load %arg5[%c4_37, %c0_38, %c0_39] : memref<5x1x128xf32, #tpu.memory_space<vmem>>, vector<1x1x128xf32>
    %46 = vector.shape_cast %45 : vector<1x1x128xf32> to vector<1x128xf32>
    %47 = vector.broadcast %46 : vector<1x128xf32> to vector<32x128xf32>
    %48 = arith.addf %44, %47 : vector<32x128xf32>
    %cst_40 = arith.constant 0.000000e+00 : f32
    %49 = vector.broadcast %cst_40 : f32 to vector<32x128xf32>
    %50 = arith.maximumf %48, %49 : vector<32x128xf32>
    %c0_41 = arith.constant 0 : index
    %c0_42 = arith.constant 0 : index
    %51 = vector.load %arg6[%c0_41, %c0_42] : memref<128x4xf32, #tpu.memory_space<vmem>>, vector<128x4xf32>
    %cst_43 = arith.constant dense<0.000000e+00> : vector<32x4xf32>
    %52 = tpu.matmul %50, %51, %cst_43 {dimension_numbers = #tpu.dot_dimension_numbers<[1], [0], [0], [1], [0, 0, 1, 1], [], []>} : vector<32x128xf32>, vector<128x4xf32>, vector<32x4xf32> -> vector<32x4xf32>
    %c0_44 = arith.constant 0 : index
    %c0_45 = arith.constant 0 : index
    %53 = vector.load %arg7[%c0_44, %c0_45] : memref<1x4xf32, #tpu.memory_space<vmem>>, vector<1x4xf32>
    %54 = vector.broadcast %53 : vector<1x4xf32> to vector<32x4xf32>
    %55 = arith.addf %52, %54 : vector<32x4xf32>
    %c0_46 = arith.constant 0 : index
    %c0_47 = arith.constant 0 : index
    %56 = vector.load %arg8[%c0_46, %c0_47] : memref<32x4xf32, #tpu.memory_space<vmem>>, vector<32x4xf32>
    tpu.vector_store %arg8[%c0_46, %c0_47], %55 {strides = array<i32>} : memref<32x4xf32, #tpu.memory_space<vmem>>, vector<32x4xf32>,
    return
  }
  func.func @transform_0(%arg0: i32) -> (i32, i32) {
    %c0_i32 = arith.constant 0 : i32
    %c0_i32_0 = arith.constant 0 : i32
    return %arg0, %c0_i32 : i32, i32
  }
  func.func @transform_1(%arg0: i32) -> (i32, i32) {
    %c0_i32 = arith.constant 0 : i32
    %c0_i32_0 = arith.constant 0 : i32
    %c0_i32_1 = arith.constant 0 : i32
    return %c0_i32, %c0_i32_0 : i32, i32
  }
  func.func @transform_2(%arg0: i32) -> (i32, i32) {
    %c0_i32 = arith.constant 0 : i32
    %c0_i32_0 = arith.constant 0 : i32
    %c0_i32_1 = arith.constant 0 : i32
    return %c0_i32, %c0_i32_0 : i32, i32
  }
  func.func @transform_3(%arg0: i32) -> (i32, i32, i32) {
    %c0_i32 = arith.constant 0 : i32
    %c0_i32_0 = arith.constant 0 : i32
    %c0_i32_1 = arith.constant 0 : i32
    %c0_i32_2 = arith.constant 0 : i32
    return %c0_i32, %c0_i32_0, %c0_i32_1 : i32, i32, i32
  }
  func.func @transform_4(%arg0: i32) -> (i32, i32, i32) {
    %c0_i32 = arith.constant 0 : i32
    %c0_i32_0 = arith.constant 0 : i32
    %c0_i32_1 = arith.constant 0 : i32
    %c0_i32_2 = arith.constant 0 : i32
    return %c0_i32, %c0_i32_0, %c0_i32_1 : i32, i32, i32
  }
  func.func @transform_5(%arg0: i32) -> (i32, i32) {
    %c0_i32 = arith.constant 0 : i32
    %c0_i32_0 = arith.constant 0 : i32
    %c0_i32_1 = arith.constant 0 : i32
    return %c0_i32, %c0_i32_0 : i32, i32
  }
  func.func @transform_6(%arg0: i32) -> (i32, i32) {
    %c0_i32 = arith.constant 0 : i32
    %c0_i32_0 = arith.constant 0 : i32
    %c0_i32_1 = arith.constant 0 : i32
    return %c0_i32, %c0_i32_0 : i32, i32
  }
  func.func @transform_7(%arg0: i32) -> (i32, i32) {
    %c0_i32 = arith.constant 0 : i32
    %c0_i32_0 = arith.constant 0 : i32
    return %arg0, %c0_i32 : i32, i32
  }
}

</mosaic_0001>

<bundles_post_ra>
// kernel: network_forward.1
= control target key start
LH: loop header
LB: loop body
LE: loop exit
PB: predicated region body
PF: predicated region fallthrough
CT: control target
= control target key end

     0   :  { %12 = vsyncpa [#allocation3], 0  ;;  %s1849_s24 = smov 0   ;;  %s1994_s0 = inlined_call_operand.vmem [shape: f32[64,16], index: 0, kind: input, shape index: {}]   ;;  %s1995_s1 = inlined_call_operand.vmem [shape: f32[16,128], index: 1, kind: input, shape index: {}]   ;;  %s1996_s2 = inlined_call_operand.vmem [shape: f32[1,128], index: 2, kind: input, shape index: {}]   ;;  %s1997_s3 = inlined_call_operand.hbm [shape: f32[5,128,128], index: 3, kind: input, shape index: {}]   ;;  %s1998_s4 = inlined_call_operand.vmem [shape: f32[5,1,128], index: 4, kind: input, shape index: {}]   ;;  %s1999_s5 = inlined_call_operand.vmem [shape: f32[128,4], index: 5, kind: input, shape index: {}]   ;;  %s2000_s6 = inlined_call_operand.vmem [shape: f32[1,4], index: 6, kind: input, shape index: {}]   ;;  %s2001_s7 = inlined_call_operand.vmem [shape: f32[64,4], index: 7, kind: output, shape index: {}]  }
   0x1 LB: > { %s1157_s25 = sadd.s32 4294967295, %s1804_s24   ;;  %p1159_p0 = scmp.ge.s32.totalorder %s1804_s24, 1  ;;  %s1804_s24 = sphi %s1849_s24, %s18_s24  }
   0x2   : > { %p201_p1 = scmp.lt.s32.totalorder %s1804_s24, 3  ;;  %s1806_s26 = smov [#allocation2]  }
   0x3   : > { %s219_s27 = sshll.u32 %s1806_s26, 4  ;;  %p1863_p3 = scmp.eq.s32.totalorder %s1157_s25, 0  ;;  %s220_s27 = int_to_ptr.vmem [resolvable:$true] %s219_s27 }
   0x4   : > { %p1857_p2 = pnand %p1159_p0, %p201_p1  ;;  %s1766_s10 = scalar_lea.hbm %s1997_s3, 10240 }
   0x5   : > { %s2006_s29 = scalar_select %p1863_p3, 1, 0 }
   0x6   : > { %s2005_s28 = scalar_select %p1857_p2, 1, 0 }
   0x7   : > { %p1749_p4 = pneg %p1857_p2  ;;  %p1767_p6 = scmp.ne.s32.totalorder %s1997_s3, %s1766_s10 }
   0x8   : > { %p1773_p10 = scmp.lt.u32.totalorder %s1766_s10, %s1997_s3 }
   0x9   : > { %p1871_p5 = pnand %p1863_p3, %p1749_p4 }
   0xb   : > { %p1768_p7 = pneg %p1871_p5 }
   0xd   : > { %p1769_p8 = pnand %p1768_p7, %p1767_p6 }
   0xf   : > { %p1770_p9 = pneg %p1769_p8 }
  0x11   : > { %p1775_p11 = pnand %p1773_p10, %p1770_p9 }
  0x13   : > { %1778 = shalt.err (!%p1775_p11)
}
  0x14   : > { %s1779_s15 = scalar_lea.vmem %s220_s27, 10240  ;;  %p1787_p1 = scmp.lt.s32.totalorder %s220_s27, %s220_s27 }
  0x15   : > { %p1780_p12 = scmp.ne.s32.totalorder %s220_s27, %s1779_s15  ;;  %p1788_p4 = scmp.lt.s32.totalorder %s1779_s15, %s1779_s15 }
  0x17   : > { %p1782_p13 = pnand %p1780_p12, %p1768_p7  ;;  %p1789_p3 = por %p1788_p4, %p1787_p1 }
  0x19   : > { %p1783_p0 = pneg %p1782_p13 }
  0x1b   : > { %p1790_p2 = pnand %p1789_p3, %p1783_p0 }
  0x1d   : > { %1793 = shalt.err (!%p1790_p2)
}
  0x1e   : > { %s1807_s16 = smov 128   ;;  %s1808_s17 = smov 8  }
  0x1f   : > { %1752 = dma.hbm_to_vmem [thread:$0]  (!%p1871_p5), %s1997_s3, 10240, %s220_s27, [#allocation3], %s1807_s16, %s1807_s16, %s1808_s17  }
  0x20   : > { %p2008_p6 = scmp.ne.s32.totalorder %s2005_s28, 0 }
  0x21   : > { %p2009_p8 = scmp.ne.s32.totalorder (!%p2008_p6), %s2006_s29, 0 }
  0x22   : > { %253 = sbr.rel (%p2008_p6) target bundleno = 1576 (0x628), region = 48 }
  0x29   : > { %1799 = dma.done.wait (%p2009_p8), [#allocation3], 10240  }
  0x2a   : > { %1801 = vsyncadd (%p2009_p8), [#allocation3], 4294957056  ;;  %s1164_s20 = sshll.u32 %s1157_s25, 2  ;;  %vm310_vm0 = vcmask 130048   ;;  %v301_v0 = vld [vmem:[%s1995_s1] sm:$0xff]  ;;  %v302_v1 = vld [vmem:[%s1995_s1 + $0x8] sm:$0xff] }
  0x2b   : > { %p286_p2 = scmp.lt.s32.totalorder %s1164_s20, 7  ;;  %v1549_v3 = vpack.c.bf16 %v302_v1, %v301_v0  ;;  %v408_v4 = vld [vmem:[#allocation2] sm:$0xff]  ;;  %v409_v5 = vld [vmem:[#allocation2 + $0x8] sm:$0xff]  ;;  %v410_v6 = vld [vmem:[#allocation2 + $0x10] sm:$0xff]  ;;  %vm1084_vm1 = vcmask 31744  }
  0x2c   : > { %v1553_v7 = vpack.c.bf16 %v409_v5, %v408_v4  ;;  %v411_v8 = vld [vmem:[#allocation2 + $0x18] sm:$0xff]  ;;  %v412_v11 = vld [vmem:[#allocation2 + $0x20] sm:$0xff]  ;;  %v413_v12 = vld [vmem:[#allocation2 + $0x28] sm:$0xff] }
  0x2d   : > { %s2011_s20 = smov (!%p286_p2, %s1164_s20), 7  ;;  %1550 = vmatprep.subr.bf16.mxu0 %v1549_v3  ;;  %v1557_v10 = vpack.c.bf16 %v411_v8, %v410_v6  ;;  %v1561_v14 = vpack.c.bf16 %v413_v12, %v412_v11  ;;  %v414_v16 = vld [vmem:[#allocation2 + $0x30] sm:$0xff]  ;;  %v415_v17 = vld [vmem:[#allocation2 + $0x38] sm:$0xff]  ;;  %v416_v19 = vld [vmem:[#allocation2 + $0x40] sm:$0xff] }
  0x2e   : > { %s1165_s21 = sshll.u32 %s2011_s20, 3  ;;  %1552 = vmatpush3.bf16.msra.mxu0 %v1549_v3  ;;  %1554 = vmatprep.subr.bf16.mxu1 %v1553_v7  ;;  %v1565_v18 = vpack.c.bf16 %v415_v17, %v414_v16  ;;  %v417_v20 = vld [vmem:[#allocation2 + $0x48] sm:$0xff]  ;;  %v418_v22 = vld [vmem:[#allocation2 + $0x50] sm:$0xff]  ;;  %v419_v23 = vld [vmem:[#allocation2 + $0x58] sm:$0xff] }
  0x2f   : > { %s289_s26 = scalar_lea.vmem %s1994_s0, %s1165_s21  ;;  %1556 = vmatpush3.bf16.msra.mxu1 %v1553_v7  ;;  %v1569_v21 = vpack.c.bf16 %v417_v20, %v416_v19  ;;  %v1573_v24 = vpack.c.bf16 %v419_v23, %v418_v22  ;;  %v420_v25 = vld [vmem:[#allocation2 + $0x60] sm:$0xff]  ;;  %v421_v26 = vld [vmem:[#allocation2 + $0x68] sm:$0xff]  ;;  %v422_v28 = vld [vmem:[#allocation2 + $0x70] sm:$0xff]  ;;  %s295_s15 = scalar_lea.vmem %s2001_s7, %s1165_s21 }
  0x30   : > { %v297_v2 = vld [vmem:[%s289_s26] sm:$0xff]  ;;  %v298_v9 = vld [vmem:[%s289_s26 + $0x8] sm:$0xff]  ;;  %v299_v13 = vld [vmem:[%s289_s26 + $0x10] sm:$0xff]  ;;  %1558 = vmatprep.subr.bf16.mxu1 %v1557_v10  ;;  %v1577_v27 = vpack.c.bf16 %v421_v26, %v420_v25 }
  0x31   : > { %1315 = vmatprep.mubr.msk.f32.mxu0 %vm310_vm0, %v297_v2  ;;  %v300_v15 = vld [vmem:[%s289_s26 + $0x18] sm:$0xff]  ;;  %v521_v31 = vld [vmem:[#allocation2 + $0x80] sm:$0xff]  ;;  %v522_v32 = vld [vmem:[#allocation2 + $0x88] sm:$0xff] }
  0x32   : > { %1316 = vmatmul.mubr.msk.f32.vlgmr.msra.gmra.mrb[0].mxu0 %vm310_vm0, %v298_v9  ;;  %v423_v29 = vld [vmem:[#allocation2 + $0x78] sm:$0xff]  ;;  %v523_v33 = vld [vmem:[#allocation2 + $0x90] sm:$0xff]  ;;  %v1585_v34 = vpack.c.bf16 %v522_v32, %v521_v31  ;;  %v525_v37 = vld [vmem:[#allocation2 + $0xa0] sm:$0xff] }
  0x33   : > { %1318 = vmatprep.mubr.msk.f32.mxu0 %vm310_vm0, %v299_v13  ;;  %1560 = vmatpush3.bf16.msra.mxu1 %v1557_v10  ;;  %v1581_v30 = vpack.c.bf16 %v423_v29, %v422_v28  ;;  %v524_v35 = vld [vmem:[#allocation2 + $0x98] sm:$0xff]  ;;  %v526_v38 = vld [vmem:[#allocation2 + $0xa8] sm:$0xff]  ;;  %v527_v40 = vld [vmem:[#allocation2 + $0xb0] sm:$0xff] }
  0x34   : > { %1562 = vmatprep.subr.bf16.mxu1 %v1561_v14  ;;  %v1589_v36 = vpack.c.bf16 %v524_v35, %v523_v33  ;;  %1586 = vmatprep.subr.bf16.mxu0 %v1585_v34  ;;  %v1593_v39 = vpack.c.bf16 %v526_v38, %v525_v37  ;;  %v528_v41 = vld [vmem:[#allocation2 + $0xb8] sm:$0xff]  ;;  %v529_v43 = vld [vmem:[#allocation2 + $0xc0] sm:$0xff]  ;;  %v530_v44 = vld [vmem:[#allocation2 + $0xc8] sm:$0xff] }
  0x35   : > { %1588 = vmatpush3.bf16.msra.mxu0 %v1585_v34  ;;  %v1597_v42 = vpack.c.bf16 %v528_v41, %v527_v40  ;;  %v1601_v45 = vpack.c.bf16 %v530_v44, %v529_v43  ;;  %v531_v46 = vld [vmem:[#allocation2 + $0xd0] sm:$0xff]  ;;  %v532_v47 = vld [vmem:[#allocation2 + $0xd8] sm:$0xff]  ;;  %v533_v49 = vld [vmem:[#allocation2 + $0xe0] sm:$0xff] }
  0x36   : > { %1319 = vmatmul.mubr.msk.f32.gmra.mrb[2].mxu0 %vm310_vm0, %v300_v15  ;;  %1590 = vmatprep.subr.bf16.mxu0 %v1589_v36  ;;  %v1605_v48 = vpack.c.bf16 %v532_v47, %v531_v46  ;;  %v534_v50 = vld [vmem:[#allocation2 + $0xe8] sm:$0xff]  ;;  %v1168_v52 = vld [vmem:[%s1996_s2] ss:$0 sm:$0xff]  ;;  %v535_v61 = vld [vmem:[#allocation2 + $0xf0] sm:$0xff] }
  0x37   : > { %1564 = vmatpush3.bf16.msra.mxu1 %v1561_v14  ;;  %v1609_v51 = vpack.c.bf16 %v534_v50, %v533_v49  ;;  %v536_v62 = vld [vmem:[#allocation2 + $0xf8] sm:$0xff]  ;;  %v635_v0 = vld [vmem:[#allocation2 + $0x100] sm:$0xff]  ;;  %v636_v1 = vld [vmem:[#allocation2 + $0x108] sm:$0xff] }
  0x38   : > { %1566 = vmatprep.subr.bf16.mxu1 %v1565_v18  ;;  %v1613_v63 = vpack.c.bf16 %v536_v62, %v535_v61  ;;  %v637_v2 = vld [vmem:[#allocation2 + $0x110] sm:$0xff]  ;;  %v1617_v3 = vpack.c.bf16 %v636_v1, %v635_v0  ;;  %v638_v4 = vld [vmem:[#allocation2 + $0x118] sm:$0xff]  ;;  %v639_v6 = vld [vmem:[#allocation2 + $0x120] sm:$0xff] }
  0x39   : > { %1592 = vmatpush3.bf16.msra.mxu0 %v1589_v36  ;;  %v1621_v5 = vpack.c.bf16 %v638_v4, %v637_v2  ;;  %v640_v7 = vld [vmem:[#allocation2 + $0x128] sm:$0xff]  ;;  %v641_v9 = vld [vmem:[#allocation2 + $0x130] sm:$0xff]  ;;  %v642_v10 = vld [vmem:[#allocation2 + $0x138] sm:$0xff] }
  0x3a   : > { %1594 = vmatprep.subr.bf16.mxu0 %v1593_v39  ;;  %v1625_v8 = vpack.c.bf16 %v640_v7, %v639_v6  ;;  %v1629_v11 = vpack.c.bf16 %v642_v10, %v641_v9  ;;  %v643_v12 = vld [vmem:[#allocation2 + $0x140] sm:$0xff]  ;;  %v644_v13 = vld [vmem:[#allocation2 + $0x148] sm:$0xff]  ;;  %v645_v15 = vld [vmem:[#allocation2 + $0x150] sm:$0xff] }
  0x3b   : > { %1568 = vmatpush3.bf16.msra.mxu1 %v1565_v18  ;;  %v1633_v14 = vpack.c.bf16 %v644_v13, %v643_v12  ;;  %v646_v16 = vld [vmem:[#allocation2 + $0x158] sm:$0xff]  ;;  %v647_v18 = vld [vmem:[#allocation2 + $0x160] sm:$0xff]  ;;  %v648_v19 = vld [vmem:[#allocation2 + $0x168] sm:$0xff] }
  0x3c   : > { %1570 = vmatprep.subr.bf16.mxu1 %v1569_v21  ;;  %v1637_v17 = vpack.c.bf16 %v646_v16, %v645_v15  ;;  %v1641_v20 = vpack.c.bf16 %v648_v19, %v647_v18  ;;  %v649_v34 = vld [vmem:[#allocation2 + $0x170] sm:$0xff]  ;;  %v650_v35 = vld [vmem:[#allocation2 + $0x178] sm:$0xff]  ;;  %v749_v37 = vld [vmem:[#allocation2 + $0x180] sm:$0xff] }
  0x3d   : > { %1596 = vmatpush3.bf16.msra.mxu0 %v1593_v39  ;;  %v1645_v36 = vpack.c.bf16 %v650_v35, %v649_v34  ;;  %v750_v38 = vld [vmem:[#allocation2 + $0x188] sm:$0xff]  ;;  %v751_v39 = vld [vmem:[#allocation2 + $0x190] sm:$0xff]  ;;  %v752_v41 = vld [vmem:[#allocation2 + $0x198] sm:$0xff] }
  0x3e   : > { %1598 = vmatprep.subr.bf16.mxu0 %v1597_v42  ;;  %v1649_v40 = vpack.c.bf16 %v750_v38, %v749_v37  ;;  %v753_v43 = vld [vmem:[#allocation2 + $0x1a0] sm:$0xff]  ;;  %v754_v44 = vld [vmem:[#allocation2 + $0x1a8] sm:$0xff]  ;;  %v755_v46 = vld [vmem:[#allocation2 + $0x1b0] sm:$0xff] }
  0x3f   : > { %1572 = vmatpush3.bf16.msra.mxu1 %v1569_v21  ;;  %v1173_v21 = vld [vmem:[%s1998_s4] ss:$0 sm:$0xff]  ;;  %v756_v47 = vld [vmem:[#allocation2 + $0x1b8] sm:$0xff]  ;;  %v758_v50 = vld [vmem:[#allocation2 + $0x1c8] sm:$0xff] }
  0x40   : > { %1574 = vmatprep.subr.bf16.mxu1 %v1573_v24  ;;  %v757_v49 = vld [vmem:[#allocation2 + $0x1c0] sm:$0xff]  ;;  %v763_v7 = vld [vmem:[#allocation2 + $0x1f0] sm:$0xff] }
  0x41   : > { %1600 = vmatpush3.bf16.msra.mxu0 %v1597_v42  ;;  %v1653_v42 = vpack.c.bf16 %v752_v41, %v751_v39  ;;  %v863_v10 = vld [vmem:[#allocation2 + $0x200] sm:$0xff]  ;;  %v865_v12 = vld [vmem:[#allocation2 + $0x210] sm:$0xff] }
  0x42   : > { %1602 = vmatprep.subr.bf16.mxu0 %v1601_v45  ;;  %v867_v16 = vld [vmem:[#allocation2 + $0x220] sm:$0xff]  ;;  %v869_v19 = vld [vmem:[#allocation2 + $0x230] sm:$0xff] }
  0x43   : > { %1576 = vmatpush3.bf16.msra.mxu1 %v1573_v24 }
  0x44   : > { %1578 = vmatprep.subr.bf16.mxu1 %v1577_v27 }
  0x45   : > { %1604 = vmatpush3.bf16.msra.mxu0 %v1601_v45  ;;  %v1657_v45 = vpack.c.bf16 %v754_v44, %v753_v43  ;;  %v877_v44 = vld [vmem:[#allocation2 + $0x270] sm:$0xff] }
  0x46   : > { %1606 = vmatprep.subr.bf16.mxu0 %v1605_v48 }
  0x47   : > { %1580 = vmatpush3.bf16.msra.mxu1 %v1577_v27 }
  0x48   : > { %1582 = vmatprep.subr.bf16.mxu1 %v1581_v30 }
  0x49   : > { %1608 = vmatpush3.bf16.msra.mxu0 %v1605_v48  ;;  %v1661_v48 = vpack.c.bf16 %v756_v47, %v755_v46  ;;  %v976_v47 = vld [vmem:[%s1999_s5] sm:$0xff] }
  0x4a   : > { %1610 = vmatprep.subr.bf16.mxu0 %v1609_v51 }
  0x4b   : > { %1584 = vmatpush3.bf16.msra.mxu1 %v1581_v30 }
  0x4c   : > { %1618 = vmatprep.subr.bf16.mxu1 %v1617_v3 }
  0x4d   : > { %1612 = vmatpush3.bf16.msra.mxu0 %v1609_v51  ;;  %v1665_v51 = vpack.c.bf16 %v758_v50, %v757_v49  ;;  %v978_v49 = vld [vmem:[%s1999_s5 + $0x10] sm:$0xff] }
  0x4e   : > { %1614 = vmatprep.subr.bf16.mxu0 %v1613_v63 }
  0x51   : > { %1616 = vmatpush3.bf16.msra.mxu0 %v1613_v63 }
  0x52   : > { %1650 = vmatprep.subr.bf16.mxu0 %v1649_v40 }
 0x105   : > { %v1317_v53 = vpop.f32.mrb[0].mxu0 }
 0x106   : > { %v389_v54 = vpop.f32.mrb[1].mxu0  ;;  %v395_v56 = vadd.f32 %v1317_v53, %v1168_v52  ;;  %v760_v53 = vld [vmem:[#allocation2 + $0x1d8] sm:$0xff] }
 0x107   : > { %v390_v55 = vadd.f32 %v1168_v52, %v389_v54 }
 0x109   : > { %v1320_v57 = vpop.f32.mrb[2].mxu0  ;;  %1353 = vmatprep.mubr.f32.mxu1 %v390_v55  ;;  %v761_v55 = vld [vmem:[#allocation2 + $0x1e0] sm:$0xff] }
 0x10a   : > { %v399_v58 = vpop.f32.mrb[3].mxu0  ;;  %1354 = vmatmul.mubr.f32.vlgmr.msra.gmra.mrb[0].mxu1 %v395_v56  ;;  %v405_v60 = vadd.f32 %v1320_v57, %v1168_v52  ;;  %v762_v56 = vld [vmem:[#allocation2 + $0x1e8] sm:$0xff] }
 0x10b   : > { %v400_v59 = vadd.f32 %v1168_v52, %v399_v58  ;;  %1620 = vmatpush3.bf16.msra.mxu1 %v1617_v3  ;;  %v759_v52 = vld [vmem:[#allocation2 + $0x1d0] sm:$0xff]  ;;  %v1673_v57 = vpack.c.bf16 %v762_v56, %v761_v55  ;;  %v1175_v58 = vld [vmem:[%s1998_s4 + $0x1] ss:$0 sm:$0xff] }
 0x10c   : > { %1622 = vmatprep.subr.bf16.mxu1 %v1621_v5  ;;  %v1669_v54 = vpack.c.bf16 %v760_v53, %v759_v52  ;;  %v980_v53 = vld [vmem:[%s1999_s5 + $0x20] sm:$0xff]  ;;  %v982_v56 = vld [vmem:[%s1999_s5 + $0x30] sm:$0xff] }
 0x10d   : > { %1356 = vmatprep.mubr.f32.mxu1 %v400_v59 }
 0x10e   : > { %1357 = vmatmul.mubr.f32.gmra.mrb[2].mxu1 %v405_v60 }
 0x10f   : > { %1624 = vmatpush3.bf16.msra.mxu1 %v1621_v5 }
 0x110   : > { %1626 = vmatprep.subr.bf16.mxu1 %v1625_v8 }
 0x113   : > { %1628 = vmatpush3.bf16.msra.mxu1 %v1625_v8  ;;  %v764_v8 = vld [vmem:[#allocation2 + $0x1f8] sm:$0xff] }
 0x114   : > { %1630 = vmatprep.subr.bf16.mxu1 %v1629_v11  ;;  %v1677_v9 = vpack.c.bf16 %v764_v8, %v763_v7 }
 0x117   : > { %1632 = vmatpush3.bf16.msra.mxu1 %v1629_v11  ;;  %v864_v11 = vld [vmem:[#allocation2 + $0x208] sm:$0xff] }
 0x118   : > { %1634 = vmatprep.subr.bf16.mxu1 %v1633_v14  ;;  %v1681_v13 = vpack.c.bf16 %v864_v11, %v863_v10 }
 0x11b   : > { %1636 = vmatpush3.bf16.msra.mxu1 %v1633_v14  ;;  %v866_v14 = vld [vmem:[#allocation2 + $0x218] sm:$0xff] }
 0x11c   : > { %1638 = vmatprep.subr.bf16.mxu1 %v1637_v17  ;;  %v1685_v15 = vpack.c.bf16 %v866_v14, %v865_v12 }
 0x11f   : > { %1640 = vmatpush3.bf16.msra.mxu1 %v1637_v17  ;;  %v868_v17 = vld [vmem:[#allocation2 + $0x228] sm:$0xff] }
 0x120   : > { %1642 = vmatprep.subr.bf16.mxu1 %v1641_v20  ;;  %v1689_v18 = vpack.c.bf16 %v868_v17, %v867_v16  ;;  %v990_v17 = vld [vmem:[%s1999_s5 + $0x70] sm:$0xff] }
 0x123   : > { %1644 = vmatpush3.bf16.msra.mxu1 %v1641_v20  ;;  %v870_v20 = vld [vmem:[#allocation2 + $0x238] sm:$0xff] }
 0x124   : > { %1646 = vmatprep.subr.bf16.mxu1 %v1645_v36 }
 0x127   : > { %1648 = vmatpush3.bf16.msra.mxu1 %v1645_v36 }
 0x128   : > { %1682 = vmatprep.subr.bf16.mxu1 %v1681_v13 }
 0x1dd   : > { %v1355_v22 = vpop.f32.mrb[0].mxu1 }
 0x1de   : > { %v503_v23 = vadd.f32 %v1355_v22, %v1173_v21  ;;  %v497_v24 = vpop.f32.mrb[1].mxu1  ;;  %v871_v22 = vld [vmem:[#allocation2 + $0x240] sm:$0xff] }
 0x1df   : > { %v498_v25 = vadd.f32 %v1173_v21, %v497_v24 }
 0x1e0   : > { %v517_v28 = vmax.f32 %v503_v23, 0.0  ;;  %v872_v23 = vld [vmem:[#allocation2 + $0x248] sm:$0xff] }
 0x1e1   : > { %v516_v26 = vmax.f32 %v498_v25, 0.0  ;;  %v1358_v27 = vpop.f32.mrb[2].mxu1  ;;  %v1697_v24 = vpack.c.bf16 %v872_v23, %v871_v22  ;;  %v873_v25 = vld [vmem:[#allocation2 + $0x250] sm:$0xff] }
 0x1e2   : > { %v513_v29 = vadd.f32 %v1358_v27, %v1173_v21  ;;  %v507_v30 = vpop.f32.mrb[3].mxu1 }
 0x1e3   : > { %v508_v31 = vadd.f32 %v1173_v21, %v507_v30  ;;  %1391 = vmatprep.mubr.f32.mxu0 %v516_v26  ;;  %v1693_v21 = vpack.c.bf16 %v870_v20, %v869_v19  ;;  %v874_v26 = vld [vmem:[#allocation2 + $0x258] sm:$0xff]  ;;  %v1181_v20 = vld [vmem:[%s1998_s4 + $0x4] ss:$0 sm:$0xff] }
 0x1e4   : > { %1392 = vmatmul.mubr.f32.vlgmr.msra.gmra.mrb[4].mxu0 %v517_v28  ;;  %v519_v33 = vmax.f32 %v513_v29, 0.0  ;;  %v1701_v27 = vpack.c.bf16 %v874_v26, %v873_v25  ;;  %v875_v28 = vld [vmem:[#allocation2 + $0x260] sm:$0xff]  ;;  %v876_v29 = vld [vmem:[#allocation2 + $0x268] sm:$0xff] }
 0x1e5   : > { %v518_v32 = vmax.f32 %v508_v31, 0.0  ;;  %1652 = vmatpush3.bf16.msra.mxu0 %v1649_v40  ;;  %v1705_v30 = vpack.c.bf16 %v876_v29, %v875_v28  ;;  %v1177_v31 = vld [vmem:[%s1998_s4 + $0x2] ss:$0 sm:$0xff] }
 0x1e6   : > { %1654 = vmatprep.subr.bf16.mxu0 %v1653_v42 }
 0x1e7   : > { %1394 = vmatprep.mubr.f32.mxu0 %v518_v32 }
 0x1e8   : > { %1395 = vmatmul.mubr.f32.gmra.mrb[6].mxu0 %v519_v33 }
 0x1e9   : > { %1656 = vmatpush3.bf16.msra.mxu0 %v1653_v42 }
 0x1ea   : > { %1658 = vmatprep.subr.bf16.mxu0 %v1657_v45 }
 0x1ed   : > { %1660 = vmatpush3.bf16.msra.mxu0 %v1657_v45  ;;  %v878_v45 = vld [vmem:[#allocation2 + $0x278] sm:$0xff] }
 0x1ee   : > { %1662 = vmatprep.subr.bf16.mxu0 %v1661_v48  ;;  %v1709_v46 = vpack.c.bf16 %v878_v45, %v877_v44 }
 0x1f1   : > { %1664 = vmatpush3.bf16.msra.mxu0 %v1661_v48  ;;  %v977_v48 = vld [vmem:[%s1999_s5 + $0x8] sm:$0xff] }
 0x1f2   : > { %1666 = vmatprep.subr.bf16.mxu0 %v1665_v51  ;;  %v1713_v50 = vpack.c.bf16 %v977_v48, %v976_v47 }
 0x1f5   : > { %1668 = vmatpush3.bf16.msra.mxu0 %v1665_v51  ;;  %v979_v51 = vld [vmem:[%s1999_s5 + $0x18] sm:$0xff] }
 0x1f6   : > { %1670 = vmatprep.subr.bf16.mxu0 %v1669_v54  ;;  %v1717_v52 = vpack.c.bf16 %v979_v51, %v978_v49 }
 0x1f9   : > { %1672 = vmatpush3.bf16.msra.mxu0 %v1669_v54  ;;  %v981_v54 = vld [vmem:[%s1999_s5 + $0x28] sm:$0xff] }
 0x1fa   : > { %1674 = vmatprep.subr.bf16.mxu0 %v1673_v57  ;;  %v1721_v55 = vpack.c.bf16 %v981_v54, %v980_v53 }
 0x1fd   : > { %1676 = vmatpush3.bf16.msra.mxu0 %v1673_v57  ;;  %v983_v57 = vld [vmem:[%s1999_s5 + $0x38] sm:$0xff] }
 0x1fe   : > { %1678 = vmatprep.subr.bf16.mxu0 %v1677_v9 }
 0x201   : > { %1680 = vmatpush3.bf16.msra.mxu0 %v1677_v9 }
 0x202   : > { %1714 = vmatprep.subr.bf16.mxu0 %v1713_v50 }
 0x2b7   : > { %v1393_v59 = vpop.f32.mrb[4].mxu0 }
 0x2b8   : > { %v617_v60 = vadd.f32 %v1393_v59, %v1175_v58  ;;  %v611_v61 = vpop.f32.mrb[5].mxu0  ;;  %v984_v59 = vld [vmem:[%s1999_s5 + $0x40] sm:$0xff] }
 0x2b9   : > { %v612_v62 = vadd.f32 %v1175_v58, %v611_v61 }
 0x2ba   : > { %v631_v1 = vmax.f32 %v617_v60, 0.0  ;;  %v985_v60 = vld [vmem:[%s1999_s5 + $0x48] sm:$0xff] }
 0x2bb   : > { %v630_v63 = vmax.f32 %v612_v62, 0.0  ;;  %v1396_v0 = vpop.f32.mrb[6].mxu0  ;;  %v1729_v61 = vpack.c.bf16 %v985_v60, %v984_v59  ;;  %v986_v62 = vld [vmem:[%s1999_s5 + $0x50] sm:$0xff] }
 0x2bc   : > { %v627_v2 = vadd.f32 %v1396_v0, %v1175_v58  ;;  %v621_v3 = vpop.f32.mrb[7].mxu0 }
 0x2bd   : > { %v622_v4 = vadd.f32 %v1175_v58, %v621_v3  ;;  %1429 = vmatprep.mubr.f32.mxu1 %v630_v63  ;;  %v1725_v58 = vpack.c.bf16 %v983_v57, %v982_v56  ;;  %v987_v63 = vld [vmem:[%s1999_s5 + $0x58] sm:$0xff] }
 0x2be   : > { %1430 = vmatmul.mubr.f32.vlgmr.msra.gmra.mrb[4].mxu1 %v631_v1  ;;  %v633_v6 = vmax.f32 %v627_v2, 0.0  ;;  %v1733_v0 = vpack.c.bf16 %v987_v63, %v986_v62  ;;  %v988_v1 = vld [vmem:[%s1999_s5 + $0x60] sm:$0xff]  ;;  %v989_v2 = vld [vmem:[%s1999_s5 + $0x68] sm:$0xff] }
 0x2bf   : > { %v632_v5 = vmax.f32 %v622_v4, 0.0  ;;  %1684 = vmatpush3.bf16.msra.mxu1 %v1681_v13  ;;  %v1737_v3 = vpack.c.bf16 %v989_v2, %v988_v1  ;;  %v1179_v4 = vld [vmem:[%s1998_s4 + $0x3] ss:$0 sm:$0xff] }
 0x2c0   : > { %1686 = vmatprep.subr.bf16.mxu1 %v1685_v15 }
 0x2c1   : > { %1432 = vmatprep.mubr.f32.mxu1 %v632_v5 }
 0x2c2   : > { %1433 = vmatmul.mubr.f32.gmra.mrb[6].mxu1 %v633_v6 }
 0x2c3   : > { %1688 = vmatpush3.bf16.msra.mxu1 %v1685_v15 }
 0x2c4   : > { %1690 = vmatprep.subr.bf16.mxu1 %v1689_v18 }
 0x2c7   : > { %1692 = vmatpush3.bf16.msra.mxu1 %v1689_v18  ;;  %v991_v18 = vld [vmem:[%s1999_s5 + $0x78] sm:$0xff] }
 0x2c8   : > { %1694 = vmatprep.subr.bf16.mxu1 %v1693_v21  ;;  %v1741_v19 = vpack.c.bf16 %v991_v18, %v990_v17 }
 0x2cb   : > { %1696 = vmatpush3.bf16.msra.mxu1 %v1693_v21 }
 0x2cc   : > { %1698 = vmatprep.subr.bf16.mxu1 %v1697_v24 }
 0x2cf   : > { %1700 = vmatpush3.bf16.msra.mxu1 %v1697_v24 }
 0x2d0   : > { %1702 = vmatprep.subr.bf16.mxu1 %v1701_v27 }
 0x2d3   : > { %1704 = vmatpush3.bf16.msra.mxu1 %v1701_v27 }
 0x2d4   : > { %1706 = vmatprep.subr.bf16.mxu1 %v1705_v30 }
 0x2d7   : > { %1708 = vmatpush3.bf16.msra.mxu1 %v1705_v30 }
 0x2d8   : > { %1710 = vmatprep.subr.bf16.mxu1 %v1709_v46 }
 0x2db   : > { %1712 = vmatpush3.bf16.msra.mxu1 %v1709_v46 }
 0x391   : > { %v1431_v32 = vpop.f32.mrb[4].mxu1 }
 0x392   : > { %v731_v33 = vadd.f32 %v1431_v32, %v1177_v31  ;;  %v725_v34 = vpop.f32.mrb[5].mxu1 }
 0x393   : > { %v726_v35 = vadd.f32 %v1177_v31, %v725_v34 }
 0x394   : > { %v745_v38 = vmax.f32 %v731_v33, 0.0  ;;  %v1182_v33 = vld [vmem:[%s2000_s6] ss:$0 sm:$0xff] }
 0x395   : > { %v744_v36 = vmax.f32 %v726_v35, 0.0  ;;  %v1434_v37 = vpop.f32.mrb[6].mxu1 }
 0x396   : > { %v741_v39 = vadd.f32 %v1434_v37, %v1177_v31  ;;  %v735_v40 = vpop.f32.mrb[7].mxu1 }
 0x397   : > { %v736_v41 = vadd.f32 %v1177_v31, %v735_v40  ;;  %1467 = vmatprep.mubr.f32.mxu0 %v744_v36 }
 0x398   : > { %1468 = vmatmul.mubr.f32.vlgmr.msra.gmra.mrb[8].mxu0 %v745_v38  ;;  %v747_v43 = vmax.f32 %v741_v39, 0.0 }
 0x399   : > { %v746_v42 = vmax.f32 %v736_v41, 0.0  ;;  %1716 = vmatpush3.bf16.msra.mxu0 %v1713_v50 }
 0x39a   : > { %1718 = vmatprep.subr.bf16.mxu0 %v1717_v52 }
 0x39b   : > { %1470 = vmatprep.mubr.f32.mxu0 %v746_v42 }
 0x39c   : > { %1471 = vmatmul.mubr.f32.gmra.mrb[10].mxu0 %v747_v43 }
 0x39d   : > { %1720 = vmatpush3.bf16.msra.mxu0 %v1717_v52 }
 0x39e   : > { %1722 = vmatprep.subr.bf16.mxu0 %v1721_v55 }
 0x3a1   : > { %1724 = vmatpush3.bf16.msra.mxu0 %v1721_v55 }
 0x3a2   : > { %1726 = vmatprep.subr.bf16.mxu0 %v1725_v58 }
 0x3a5   : > { %1728 = vmatpush3.bf16.msra.mxu0 %v1725_v58 }
 0x3a6   : > { %1730 = vmatprep.subr.bf16.mxu0 %v1729_v61 }
 0x3a9   : > { %1732 = vmatpush3.bf16.msra.mxu0 %v1729_v61 }
 0x3aa   : > { %1734 = vmatprep.subr.bf16.mxu0 %v1733_v0 }
 0x3ad   : > { %1736 = vmatpush3.bf16.msra.mxu0 %v1733_v0 }
 0x3ae   : > { %1738 = vmatprep.subr.bf16.mxu0 %v1737_v3 }
 0x3b1   : > { %1740 = vmatpush3.bf16.msra.mxu0 %v1737_v3 }
 0x3b2   : > { %1742 = vmatprep.subr.bf16.mxu0 %v1741_v19 }
 0x3b5   : > { %1744 = vmatpush3.bf16.msra.mxu0 %v1741_v19 }
 0x46b   : > { %v1469_v5 = vpop.f32.mrb[8].mxu0 }
 0x46c   : > { %v845_v6 = vadd.f32 %v1469_v5, %v1179_v4  ;;  %v839_v7 = vpop.f32.mrb[9].mxu0 }
 0x46d   : > { %v840_v8 = vadd.f32 %v1179_v4, %v839_v7 }
 0x46e   : > { %v859_v11 = vmax.f32 %v845_v6, 0.0 }
 0x46f   : > { %v858_v9 = vmax.f32 %v840_v8, 0.0  ;;  %v1472_v10 = vpop.f32.mrb[10].mxu0 }
 0x470   : > { %v855_v12 = vadd.f32 %v1472_v10, %v1179_v4  ;;  %v849_v13 = vpop.f32.mrb[11].mxu0 }
 0x471   : > { %v850_v14 = vadd.f32 %v1179_v4, %v849_v13  ;;  %1505 = vmatprep.mubr.f32.mxu1 %v858_v9 }
 0x472   : > { %1506 = vmatmul.mubr.f32.vlgmr.msra.gmra.mrb[8].mxu1 %v859_v11  ;;  %v861_v16 = vmax.f32 %v855_v12, 0.0 }
 0x473   : > { %v860_v15 = vmax.f32 %v850_v14, 0.0 }
 0x475   : > { %1508 = vmatprep.mubr.f32.mxu1 %v860_v15 }
 0x476   : > { %1509 = vmatmul.mubr.f32.gmra.mrb[10].mxu1 %v861_v16 }
 0x545   : > { %v1507_v21 = vpop.f32.mrb[8].mxu1 }
 0x546   : > { %v959_v22 = vadd.f32 %v1507_v21, %v1181_v20  ;;  %v953_v23 = vpop.f32.mrb[9].mxu1 }
 0x547   : > { %v954_v24 = vadd.f32 %v1181_v20, %v953_v23 }
 0x548   : > { %v973_v27 = vmax.f32 %v959_v22, 0.0 }
 0x549   : > { %v972_v25 = vmax.f32 %v954_v24, 0.0  ;;  %v1510_v26 = vpop.f32.mrb[10].mxu1 }
 0x54a   : > { %v969_v28 = vadd.f32 %v1510_v26, %v1181_v20  ;;  %v963_v29 = vpop.f32.mrb[11].mxu1 }
 0x54b   : > { %v964_v30 = vadd.f32 %v1181_v20, %v963_v29  ;;  %1543 = vmatprep.mubr.f32.mxu0 %v972_v25 }
 0x54c   : > { %1544 = vmatmul.mubr.f32.vlgmr.msra.gmra.mrb[12].mxu0 %v973_v27  ;;  %v975_v32 = vmax.f32 %v969_v28, 0.0 }
 0x54d   : > { %v974_v31 = vmax.f32 %v964_v30, 0.0 }
 0x54f   : > { %1546 = vmatprep.mubr.f32.mxu0 %v974_v31 }
 0x550   : > { %1547 = vmatmul.mubr.f32.gmra.mrb[14].mxu0 %v975_v32 }
 0x61f   : > { %v1545_v34 = vpop.f32.mrb[12].mxu0 }
 0x620   : > { %v1065_v35 = vpop.f32.mrb[13].mxu0  ;;  %v1071_v37 = vadd.f32 %v1545_v34, %v1182_v33 }
 0x621   : > { %v1066_v36 = vadd.f32 %v1182_v33, %v1065_v35 }
 0x622   : > { %1086 = vst.msk [vmem:[%s295_s15 + $0x8] sm:$0xff] %vm1084_vm1, %v1071_v37 }
 0x623   : > { %1085 = vst.msk [vmem:[%s295_s15] sm:$0xff] %vm1084_vm1, %v1066_v36  ;;  %v1548_v38 = vpop.f32.mrb[14].mxu0 }
 0x624   : > { %v1075_v39 = vpop.f32.mrb[15].mxu0  ;;  %v1081_v41 = vadd.f32 %v1548_v38, %v1182_v33 }
 0x625   : > { %v1076_v40 = vadd.f32 %v1182_v33, %v1075_v39 }
 0x626   : > { %1088 = vst.msk [vmem:[%s295_s15 + $0x18] sm:$0xff] %vm1084_vm1, %v1081_v41 }
 0x627   : > { %1087 = vst.msk [vmem:[%s295_s15 + $0x10] sm:$0xff] %vm1084_vm1, %v1076_v40 }
 0x628 PF: > { %s18_s24 = sadd.s32 1, %s1804_s24  }
 0x629   : > { %p15_p3 = scmp.ge.s32.totalorder %s18_s24, 4  }
 0x62b   :  { %17 = sbr.rel (!%p15_p3) target bundleno = 1 (0x1), region = 91 }
 0x632   :  { %1111 = vsyncpa [#allocation3], 1 }
 0x633   :  { %1113 = vsyncpa [#allocation3 + $0x1], 1 }

</bundles_post_ra>
